<compile_context>
chip_gen: v5e
topology: v5e:2x2
jax: 0.10.0
libtpu: 0.0.40
codegen_flags: <defaults>
</compile_context>

<pallas_src>
import jax
import jax.numpy as jnp
import numpy as np
from jax.experimental import pallas as pl
from jax.experimental.pallas import tpu as pltpu


# ------------------------- Pallas kernel (hot path) ---------------------------

def _relu_matmul_bias_kernel(cols_ref, w_ref, b_ref, o_ref):
    """o = W @ relu(cols) + b    (ReLU -> conv-as-matmul -> folded-BN bias).

    cols: (K, M)  im2col'd activation, M = N*H*W on the lane axis (lane-dense)
    w:    (Cout, K)  conv weights with the BN scale already folded in
    b:    (Cout, 1)  folded BN bias, broadcast along lanes
    o:    (Cout, M)  lane-dense output (full 128-lane stores)
    """
    cols = jnp.maximum(cols_ref[...], 0.0)                     # fused ReLU (pad zeros stay 0)
    acc = jnp.dot(w_ref[...], cols,
                  preferred_element_type=jnp.float32)          # MXU matmul
    o_ref[...] = acc + b_ref[...]                              # folded BatchNorm bias


_VMEM_SPEC = pl.BlockSpec(memory_space=pltpu.MemorySpace.VMEM)


def _relu_matmul_bias(cols, w, b):
    """Single-invocation (grid-less) pallas_call; whole operands resident in VMEM."""
    cout = w.shape[0]
    m = cols.shape[1]
    return pl.pallas_call(
        _relu_matmul_bias_kernel,
        out_shape=jax.ShapeDtypeStruct((cout, m), jnp.float32),
        in_specs=[_VMEM_SPEC, _VMEM_SPEC, _VMEM_SPEC],
        out_specs=_VMEM_SPEC,
    )(cols, w, b)


# ------------------------------- JAX glue -------------------------------------

def _im2col_t(x_cnhw, ksize, pad):
    """(C, N, H, W) -> (ksize*ksize*C, N*H*W); rows ordered (tap, channel). stride=1."""
    C, N, H, W = x_cnhw.shape
    xp = jnp.pad(x_cnhw, ((0, 0), (0, 0), (pad, pad), (pad, pad)))
    cols = [xp[:, :, i:i + H, j:j + W] for i in range(ksize) for j in range(ksize)]
    return jnp.stack(cols, axis=0).reshape(ksize * ksize * C, N * H * W)


def _fold_bn(w_oihw, gamma, beta, mean, var, eps=1e-5):
    """Fold eval-mode BN into the conv.

    Returns W: (Cout, k*k*Cin) with per-output-channel BN scale folded in
    (columns ordered (tap, cin) to match _im2col_t rows), and bias: (Cout, 1).
    """
    cout = w_oihw.shape[0]
    s = gamma / jnp.sqrt(var + eps)
    wm = jnp.transpose(w_oihw, (0, 2, 3, 1)).reshape(cout, -1)     # (Cout, k*k*Cin)
    wm = (wm * s[:, None]).astype(jnp.float32)                     # scale folded into weights
    bias = (beta - mean * s).reshape(cout, 1).astype(jnp.float32)
    return wm, bias


# ------------------------------ block forward ---------------------------------

def resnet_basicblock_forward(x_nchw, params):
    N, cin, H, W = x_nchw.shape
    M = N * H * W
    x_cnhw = jnp.transpose(x_nchw, (1, 0, 2, 3)).astype(jnp.float32)   # (Cin, N, H, W)

    wa, ba = _fold_bn(*params["conv_a"])
    wb, bb = _fold_bn(*params["conv_b"])
    wd, bd = _fold_bn(*params["down"])
    cout = wa.shape[0]

    # --- call 1: conv_a stage (ReLU -> 3x3 conv -> BN), lane-dense ------------
    a_cols = _im2col_t(x_cnhw, 3, 1)                     # (9*Cin, M)
    a_flat = _relu_matmul_bias(a_cols, wa, ba)           # (Cout, M)

    # --- call 2: conv_b + downsample + residual add, all in ONE matmul --------
    #   out = Wb @ relu(im2col(a)) + bb  +  Wd @ relu(x) + bd
    #       = [Wb | Wd] @ relu([im2col(a) ; x]) + (bb + bd)
    b_cols = jnp.concatenate(
        [_im2col_t(a_flat.reshape(cout, N, H, W), 3, 1),  # (9*Cout, M) conv_b patches
         x_cnhw.reshape(cin, M)],                         # (Cin, M)    1x1 downsample input
        axis=0)
    w2 = jnp.concatenate([wb, wd], axis=1)               # (Cout, 9*Cout + Cin)
    out_flat = _relu_matmul_bias(b_cols, w2, bb + bd)    # (Cout, M)

    return jnp.transpose(out_flat.reshape(cout, N, H, W), (1, 0, 2, 3))   # NCHW


# ------------------------ parameter init (deterministic) ----------------------

def _init_bn(key, c):
    k1, k2, k3, k4 = jax.random.split(key, 4)
    gamma = 0.5 + jax.random.uniform(k1, (c,), jnp.float32)
    beta = 0.1 * jax.random.normal(k2, (c,), jnp.float32)
    mean = 0.1 * jax.random.normal(k3, (c,), jnp.float32)
    var = 0.5 + jax.random.uniform(k4, (c,), jnp.float32)
    return gamma, beta, mean, var


def init_resnet_basicblock_params(key, inplanes, planes):
    ka, kb, kd, kba, kbb, kbd = jax.random.split(key, 6)
    return {
        "conv_a": (0.1 * jax.random.normal(ka, (planes, inplanes, 3, 3), jnp.float32),
                   *_init_bn(kba, planes)),
        "conv_b": (0.1 * jax.random.normal(kb, (planes, planes, 3, 3), jnp.float32),
                   *_init_bn(kbb, planes)),
        "down":   (0.1 * jax.random.normal(kd, (planes, inplanes, 1, 1), jnp.float32),
                   *_init_bn(kbd, planes)),
    }


# ------------------------------ pure-JAX reference ----------------------------

def _relu_conv_bn_ref(x_nhwc, w_oihw, gamma, beta, mean, var, stride, pad, eps=1e-5):
    xr = jnp.maximum(x_nhwc, 0.0)
    w_hwio = jnp.transpose(w_oihw, (2, 3, 1, 0))
    y = jax.lax.conv_general_dilated(
        xr, w_hwio, (stride, stride), ((pad, pad), (pad, pad)),
        dimension_numbers=("NHWC", "HWIO", "NHWC"))
    return (y - mean) / jnp.sqrt(var + eps) * gamma + beta


def resnet_basicblock_ref(x_nchw, params):
    x = jnp.transpose(x_nchw, (0, 2, 3, 1))
    a = _relu_conv_bn_ref(x, *params["conv_a"], stride=1, pad=1)
    b = _relu_conv_bn_ref(a, *params["conv_b"], stride=1, pad=1)
    r = _relu_conv_bn_ref(x, *params["down"], stride=1, pad=0)
    return jnp.transpose(r + b, (0, 3, 1, 2))


# ----------------------------------- main --------------------------------------

if __name__ == "__main__":
    N, inplanes, planes, H, W = 2, 4, 8, 16, 16   # stride=1, inplanes != planes
    key = jax.random.PRNGKey(0)
    kx, kp = jax.random.split(key)
    x = jax.random.normal(kx, (N, inplanes, H, W), jnp.float32)   # NCHW like PyTorch
    params = init_resnet_basicblock_params(kp, inplanes, planes)

    fwd = jax.jit(resnet_basicblock_forward)
    out = jax.block_until_ready(fwd(x, params))

    ref = jax.block_until_ready(resnet_basicblock_ref(x, params))
    assert out.shape == (N, planes, H, W)
    np.testing.assert_allclose(np.asarray(out), np.asarray(ref), rtol=1e-3, atol=1e-3)

    print("KERNEL_OK")
</pallas_src>

<mosaic_0001>
module attributes {stable_mosaic.version = 11 : i64} {
  func.func @_relu_matmul_bias_kernel(%arg0: memref<36x512xf32, #tpu.memory_space<vmem>>, %arg1: memref<8x36xf32, #tpu.memory_space<vmem>>, %arg2: memref<8x1xf32, #tpu.memory_space<vmem>>, %arg3: memref<8x512xf32, #tpu.memory_space<vmem>>) attributes {dimension_semantics = [], scalar_prefetch = 0 : i64, scratch_operands = 0 : i64, tpu.core_type = #tpu.core_type<tc>} {
    %c0 = arith.constant 0 : index
    %c0_0 = arith.constant 0 : index
    %0 = vector.load %arg0[%c0, %c0_0] : memref<36x512xf32, #tpu.memory_space<vmem>>, vector<36x512xf32>
    %cst = arith.constant 0.000000e+00 : f32
    %1 = vector.broadcast %cst : f32 to vector<36x512xf32>
    %2 = arith.maximumf %0, %1 : vector<36x512xf32>
    %c0_1 = arith.constant 0 : index
    %c0_2 = arith.constant 0 : index
    %3 = vector.load %arg1[%c0_1, %c0_2] : memref<8x36xf32, #tpu.memory_space<vmem>>, vector<8x36xf32>
    %cst_3 = arith.constant dense<0.000000e+00> : vector<8x512xf32>
    %4 = tpu.matmul %3, %2, %cst_3 {dimension_numbers = #tpu.dot_dimension_numbers<[1], [0], [0], [1], [0, 0, 1, 1], [], []>} : vector<8x36xf32>, vector<36x512xf32>, vector<8x512xf32> -> vector<8x512xf32>
    %c0_4 = arith.constant 0 : index
    %c0_5 = arith.constant 0 : index
    %5 = vector.load %arg2[%c0_4, %c0_5] : memref<8x1xf32, #tpu.memory_space<vmem>>, vector<8x1xf32>
    %6 = vector.broadcast %5 : vector<8x1xf32> to vector<8x512xf32>
    %7 = arith.addf %4, %6 : vector<8x512xf32>
    %c0_6 = arith.constant 0 : index
    %c0_7 = arith.constant 0 : index
    %8 = vector.load %arg3[%c0_6, %c0_7] : memref<8x512xf32, #tpu.memory_space<vmem>>, vector<8x512xf32>
    tpu.vector_store %arg3[%c0_6, %c0_7], %7 {strides = array<i32>} : memref<8x512xf32, #tpu.memory_space<vmem>>, vector<8x512xf32>,
    return
  }
}

module attributes {stable_mosaic.version = 11 : i64} {
  func.func @_relu_matmul_bias_kernel(%arg0: memref<76x512xf32, #tpu.memory_space<vmem>>, %arg1: memref<8x76xf32, #tpu.memory_space<vmem>>, %arg2: memref<8x1xf32, #tpu.memory_space<vmem>>, %arg3: memref<8x512xf32, #tpu.memory_space<vmem>>) attributes {dimension_semantics = [], scalar_prefetch = 0 : i64, scratch_operands = 0 : i64, tpu.core_type = #tpu.core_type<tc>} {
    %c0 = arith.constant 0 : index
    %c0_0 = arith.constant 0 : index
    %0 = vector.load %arg0[%c0, %c0_0] : memref<76x512xf32, #tpu.memory_space<vmem>>, vector<76x512xf32>
    %cst = arith.constant 0.000000e+00 : f32
    %1 = vector.broadcast %cst : f32 to vector<76x512xf32>
    %2 = arith.maximumf %0, %1 : vector<76x512xf32>
    %c0_1 = arith.constant 0 : index
    %c0_2 = arith.constant 0 : index
    %3 = vector.load %arg1[%c0_1, %c0_2] : memref<8x76xf32, #tpu.memory_space<vmem>>, vector<8x76xf32>
    %cst_3 = arith.constant dense<0.000000e+00> : vector<8x512xf32>
    %4 = tpu.matmul %3, %2, %cst_3 {dimension_numbers = #tpu.dot_dimension_numbers<[1], [0], [0], [1], [0, 0, 1, 1], [], []>} : vector<8x76xf32>, vector<76x512xf32>, vector<8x512xf32> -> vector<8x512xf32>
    %c0_4 = arith.constant 0 : index
    %c0_5 = arith.constant 0 : index
    %5 = vector.load %arg2[%c0_4, %c0_5] : memref<8x1xf32, #tpu.memory_space<vmem>>, vector<8x1xf32>
    %6 = vector.broadcast %5 : vector<8x1xf32> to vector<8x512xf32>
    %7 = arith.addf %4, %6 : vector<8x512xf32>
    %c0_6 = arith.constant 0 : index
    %c0_7 = arith.constant 0 : index
    %8 = vector.load %arg3[%c0_6, %c0_7] : memref<8x512xf32, #tpu.memory_space<vmem>>, vector<8x512xf32>
    tpu.vector_store %arg3[%c0_6, %c0_7], %7 {strides = array<i32>} : memref<8x512xf32, #tpu.memory_space<vmem>>, vector<8x512xf32>,
    return
  }
}

</mosaic_0001>

<bundles_post_ra>
// kernel: resnet_basicblock_forward.2
= control target key start
LH: loop header
LB: loop body
LE: loop exit
PB: predicated region body
PF: predicated region fallthrough
CT: control target
= control target key end

     0   :  { %vm65_vm0 = vcmask 1043456   ;;  %v176_v3 = vmov 0   ;;  %vm61_vm1 = vcmask 293888   ;;  %s283_s0 = inlined_call_operand.vmem [shape: f32[36,512], index: 0, kind: input, shape index: {}]   ;;  %s284_s1 = inlined_call_operand.vmem [shape: f32[8,36], index: 1, kind: input, shape index: {}]   ;;  %s285_s2 = inlined_call_operand.vmem [shape: f32[8,1], index: 2, kind: input, shape index: {}]   ;;  %s286_s3 = inlined_call_operand.vmem [shape: f32[8,512], index: 3, kind: output, shape index: {}]  }
   0x1   :  { %v32_v0 = vld [vmem:[%s283_s0 + $0x90] sm:$0xf]  ;;  %v33_v1 = vld [vmem:[%s283_s0 + $0x98] sm:$0xf]  ;;  %175 = vset.pattern.permute.xlu0 %v176_v3  ;;  %v30_v12 = vld [vmem:[%s283_s0 + $0x80] sm:$0xf] }
   0x2   :  { %v28_v2 = vld [vmem:[%s283_s0 + $0x70] sm:$0xff]  ;;  %v52_v4 = vmax.f32 %v32_v0, 0.0  ;;  %v53_v5 = vmax.f32 %v33_v1, 0.0  ;;  %v29_v7 = vld [vmem:[%s283_s0 + $0x78] sm:$0xff]  ;;  %v50_v15 = vmax.f32 %v30_v12, 0.0  ;;  %v26_v18 = vld [vmem:[%s283_s0 + $0x60] sm:$0xff] }
   0x3   :  { %v48_v6 = vmax.f32 %v28_v2, 0.0  ;;  %v24_v8 = vld [vmem:[%s283_s0 + $0x50] sm:$0xff]  ;;  %v25_v9 = vld [vmem:[%s283_s0 + $0x58] sm:$0xff]  ;;  %v49_v10 = vmax.f32 %v29_v7, 0.0  ;;  %v31_v16 = vld [vmem:[%s283_s0 + $0x88] sm:$0xf] }
   0x4   :  { %v44_v11 = vmax.f32 %v24_v8, 0.0  ;;  %v20_v13 = vld [vmem:[%s283_s0 + $0x30] sm:$0xff]  ;;  %170 = vmatpush.msk.msra.mxu2 %vm65_vm0, %v52_v4  ;;  %172 = vmatpush.msk.msra.mxu3 %vm65_vm0, %v53_v5  ;;  %v45_v14 = vmax.f32 %v25_v9, 0.0  ;;  %v21_v17 = vld [vmem:[%s283_s0 + $0x38] sm:$0xff]  ;;  %v51_v19 = vmax.f32 %v31_v16, 0.0  ;;  %v46_v20 = vmax.f32 %v26_v18, 0.0 }
   0x5   :  { %v27_v21 = vld [vmem:[%s283_s0 + $0x68] sm:$0xff]  ;;  %v16_v22 = vld [vmem:[%s283_s0 + $0x10] sm:$0xff]  ;;  %v17_v23 = vld [vmem:[%s283_s0 + $0x18] sm:$0xff]  ;;  %v40_v24 = vmax.f32 %v20_v13, 0.0  ;;  %v41_v25 = vmax.f32 %v21_v17, 0.0  ;;  %166 = vmatpush.msk.msra.mxu0 %vm65_vm0, %v50_v15 }
   0x6   :  { %130 = vmatpush.msra.mxu2 %v48_v6  ;;  %150 = vmatpush.msra.mxu3 %v49_v10  ;;  %v47_v26 = vmax.f32 %v27_v21, 0.0  ;;  %v22_v27 = vld [vmem:[%s283_s0 + $0x40] sm:$0xff]  ;;  %v23_v28 = vld [vmem:[%s283_s0 + $0x48] sm:$0xff]  ;;  %v36_v33 = vmax.f32 %v16_v22, 0.0  ;;  %v37_v34 = vmax.f32 %v17_v23, 0.0 }
   0x7   :  { %168 = vmatpush.msk.msra.mxu1 %vm65_vm0, %v51_v19  ;;  %v42_v29 = vmax.f32 %v22_v27, 0.0  ;;  %v43_v30 = vmax.f32 %v23_v28, 0.0  ;;  %v18_v31 = vld [vmem:[%s283_s0 + $0x20] sm:$0xff]  ;;  %v19_v32 = vld [vmem:[%s283_s0 + $0x28] sm:$0xff]  ;;  %90 = vmatpush.msra.mxu0 %v46_v20 }
   0x8   :  { %131 = vmatpush.msra.mxu2 %v44_v11  ;;  %151 = vmatpush.msra.mxu3 %v45_v14  ;;  %v14_v35 = vld [vmem:[%s283_s0] sm:$0xff]  ;;  %v15_v36 = vld [vmem:[%s283_s0 + $0x8] sm:$0xff]  ;;  %v38_v38 = vmax.f32 %v18_v31, 0.0  ;;  %v39_v39 = vmax.f32 %v19_v32, 0.0 }
   0x9   :  { %110 = vmatpush.msra.mxu1 %v47_v26  ;;  %v54_v37 = vld [vmem:[%s284_s1] sm:$0xff]  ;;  %91 = vmatpush.msra.mxu0 %v42_v29  ;;  %v34_v40 = vmax.f32 %v14_v35, 0.0  ;;  %v35_v41 = vmax.f32 %v15_v36, 0.0 }
   0xa   :  { %132 = vmatpush.msra.mxu2 %v40_v24  ;;  %152 = vmatpush.msra.mxu3 %v41_v25  ;;  %v55_v42 = vld [vmem:[%s285_s2] sm:$0xff] }
   0xb   :  { %111 = vmatpush.msra.mxu1 %v43_v30  ;;  %92 = vmatpush.msra.mxu0 %v38_v38 }
   0xc   :  { %133 = vmatpush.msra.mxu2 %v36_v33  ;;  %153 = vmatpush.msra.mxu3 %v37_v34 }
   0xd   :  { %171 = vmatmul.msk.f32.vlgmr.msra.gmra.mxu2 %vm61_vm1, %v54_v37  ;;  %173 = vmatmul.msk.f32.vlgmr.msra.gmra.mxu3 %vm61_vm1, %v54_v37 }
   0xe   :  { %112 = vmatpush.msra.mxu1 %v39_v39  ;;  %58 = vperm.xlu0 %175, %v55_v42  }
   0xf   :  { %93 = vmatpush.msra.mxu0 %v34_v40 }
  0x10   :  { %113 = vmatpush.msra.mxu1 %v35_v41  ;;  %167 = vmatmul.msk.f32.vlgmr.msra.gmra.mxu0 %vm61_vm1, %v54_v37 }
  0x11   :  { %169 = vmatmul.msk.f32.vlgmr.msra.gmra.mxu1 %vm61_vm1, %v54_v37 }
  0x80   :  { %v59_v43 = vpop.permute.xlu0 %58 }
  0x8d   :  { %v95_v44 = vpop.f32.mrf.mxu0 }
  0x8e   :  { %v115_v45 = vpop.f32.mrf.mxu1  ;;  %v96_v46 = vadd.f32 %v95_v44, %v59_v43 }
  0x8f   :  { %v116_v47 = vadd.f32 %v115_v45, %v59_v43 }
  0x90   :  { %v135_v48 = vpop.f32.mrf.mxu2  ;;  %v155_v49 = vpop.f32.mrf.mxu3  ;;  %158 = vst [vmem:[%s286_s3] sm:$0xff] %v96_v46 }
  0x91   :  { %v136_v50 = vadd.f32 %v135_v48, %v59_v43  ;;  %v156_v51 = vadd.f32 %v155_v49, %v59_v43  ;;  %159 = vst [vmem:[%s286_s3 + $0x8] sm:$0xff] %v116_v47 }
  0x93   :  { %160 = vst [vmem:[%s286_s3 + $0x10] sm:$0xff] %v136_v50 }
  0x94   :  { %161 = vst [vmem:[%s286_s3 + $0x18] sm:$0xff] %v156_v51 }

// kernel: resnet_basicblock_forward.3
= control target key start
LH: loop header
LB: loop body
LE: loop exit
PB: predicated region body
PF: predicated region fallthrough
CT: control target
= control target key end

     0   :  { %vm105_vm0 = vcmask 1043456   ;;  %v216_v3 = vmov 0   ;;  %vm101_vm1 = vcmask 621568   ;;  %s383_s0 = inlined_call_operand.vmem [shape: f32[76,512], index: 0, kind: input, shape index: {}]   ;;  %s384_s1 = inlined_call_operand.vmem [shape: f32[8,76], index: 1, kind: input, shape index: {}]   ;;  %s385_s2 = inlined_call_operand.vmem [shape: f32[8,1], index: 2, kind: input, shape index: {}]   ;;  %s386_s3 = inlined_call_operand.vmem [shape: f32[8,512], index: 3, kind: output, shape index: {}]  }
   0x1   :  { %v52_v0 = vld [vmem:[%s383_s0 + $0x130] sm:$0xf]  ;;  %v53_v1 = vld [vmem:[%s383_s0 + $0x138] sm:$0xf]  ;;  %215 = vset.pattern.permute.xlu0 %v216_v3  ;;  %v50_v12 = vld [vmem:[%s383_s0 + $0x120] sm:$0xf] }
   0x2   :  { %v48_v2 = vld [vmem:[%s383_s0 + $0x110] sm:$0xff]  ;;  %v92_v4 = vmax.f32 %v52_v0, 0.0  ;;  %v93_v5 = vmax.f32 %v53_v1, 0.0  ;;  %v49_v7 = vld [vmem:[%s383_s0 + $0x118] sm:$0xff]  ;;  %v90_v15 = vmax.f32 %v50_v12, 0.0  ;;  %v46_v18 = vld [vmem:[%s383_s0 + $0x100] sm:$0xff] }
   0x3   :  { %v88_v6 = vmax.f32 %v48_v2, 0.0  ;;  %v44_v8 = vld [vmem:[%s383_s0 + $0xf0] sm:$0xff]  ;;  %v45_v9 = vld [vmem:[%s383_s0 + $0xf8] sm:$0xff]  ;;  %v89_v10 = vmax.f32 %v49_v7, 0.0  ;;  %v51_v16 = vld [vmem:[%s383_s0 + $0x128] sm:$0xf] }
   0x4   :  { %v84_v11 = vmax.f32 %v44_v8, 0.0  ;;  %v40_v13 = vld [vmem:[%s383_s0 + $0xd0] sm:$0xff]  ;;  %210 = vmatpush.msk.msra.mxu2 %vm105_vm0, %v92_v4  ;;  %212 = vmatpush.msk.msra.mxu3 %vm105_vm0, %v93_v5  ;;  %v85_v14 = vmax.f32 %v45_v9, 0.0  ;;  %v41_v17 = vld [vmem:[%s383_s0 + $0xd8] sm:$0xff]  ;;  %v91_v19 = vmax.f32 %v51_v16, 0.0  ;;  %v86_v20 = vmax.f32 %v46_v18, 0.0 }
   0x5   :  { %v47_v21 = vld [vmem:[%s383_s0 + $0x108] sm:$0xff]  ;;  %v36_v22 = vld [vmem:[%s383_s0 + $0xb0] sm:$0xff]  ;;  %v37_v23 = vld [vmem:[%s383_s0 + $0xb8] sm:$0xff]  ;;  %v80_v24 = vmax.f32 %v40_v13, 0.0  ;;  %v81_v25 = vmax.f32 %v41_v17, 0.0  ;;  %206 = vmatpush.msk.msra.mxu0 %vm105_vm0, %v90_v15 }
   0x6   :  { %165 = vmatpush.msra.mxu2 %v88_v6  ;;  %185 = vmatpush.msra.mxu3 %v89_v10  ;;  %v87_v26 = vmax.f32 %v47_v21, 0.0  ;;  %v42_v27 = vld [vmem:[%s383_s0 + $0xe0] sm:$0xff]  ;;  %v43_v28 = vld [vmem:[%s383_s0 + $0xe8] sm:$0xff]  ;;  %v32_v29 = vld [vmem:[%s383_s0 + $0x90] sm:$0xff]  ;;  %v76_v35 = vmax.f32 %v36_v22, 0.0  ;;  %v77_v36 = vmax.f32 %v37_v23, 0.0 }
   0x7   :  { %208 = vmatpush.msk.msra.mxu1 %vm105_vm0, %v91_v19  ;;  %v82_v30 = vmax.f32 %v42_v27, 0.0  ;;  %v83_v31 = vmax.f32 %v43_v28, 0.0  ;;  %v33_v32 = vld [vmem:[%s383_s0 + $0x98] sm:$0xff]  ;;  %v38_v33 = vld [vmem:[%s383_s0 + $0xc0] sm:$0xff]  ;;  %v39_v34 = vld [vmem:[%s383_s0 + $0xc8] sm:$0xff]  ;;  %125 = vmatpush.msra.mxu0 %v86_v20  ;;  %v72_v43 = vmax.f32 %v32_v29, 0.0 }
   0x8   :  { %166 = vmatpush.msra.mxu2 %v84_v11  ;;  %186 = vmatpush.msra.mxu3 %v85_v14  ;;  %v34_v37 = vld [vmem:[%s383_s0 + $0xa0] sm:$0xff]  ;;  %v78_v38 = vmax.f32 %v38_v33, 0.0  ;;  %v79_v39 = vmax.f32 %v39_v34, 0.0  ;;  %v28_v40 = vld [vmem:[%s383_s0 + $0x70] sm:$0xff]  ;;  %v29_v41 = vld [vmem:[%s383_s0 + $0x78] sm:$0xff]  ;;  %v73_v44 = vmax.f32 %v33_v32, 0.0 }
   0x9   :  { %145 = vmatpush.msra.mxu1 %v87_v26  ;;  %v35_v42 = vld [vmem:[%s383_s0 + $0xa8] sm:$0xff]  ;;  %v30_v45 = vld [vmem:[%s383_s0 + $0x80] sm:$0xff]  ;;  %126 = vmatpush.msra.mxu0 %v82_v30  ;;  %v74_v47 = vmax.f32 %v34_v37, 0.0  ;;  %v24_v49 = vld [vmem:[%s383_s0 + $0x50] sm:$0xff]  ;;  %v68_v51 = vmax.f32 %v28_v40, 0.0  ;;  %v69_v52 = vmax.f32 %v29_v41, 0.0 }
   0xa   :  { %167 = vmatpush.msra.mxu2 %v80_v24  ;;  %187 = vmatpush.msra.mxu3 %v81_v25  ;;  %v31_v46 = vld [vmem:[%s383_s0 + $0x88] sm:$0xff]  ;;  %v75_v48 = vmax.f32 %v35_v42, 0.0  ;;  %v25_v50 = vld [vmem:[%s383_s0 + $0x58] sm:$0xff]  ;;  %v26_v53 = vld [vmem:[%s383_s0 + $0x60] sm:$0xff]  ;;  %v70_v55 = vmax.f32 %v30_v45, 0.0  ;;  %v64_v59 = vmax.f32 %v24_v49, 0.0 }
   0xb   :  { %146 = vmatpush.msra.mxu1 %v83_v31  ;;  %v27_v54 = vld [vmem:[%s383_s0 + $0x68] sm:$0xff]  ;;  %127 = vmatpush.msra.mxu0 %v78_v38  ;;  %v71_v56 = vmax.f32 %v31_v46, 0.0  ;;  %v20_v57 = vld [vmem:[%s383_s0 + $0x30] sm:$0xff]  ;;  %v21_v58 = vld [vmem:[%s383_s0 + $0x38] sm:$0xff]  ;;  %v65_v60 = vmax.f32 %v25_v50, 0.0  ;;  %v66_v63 = vmax.f32 %v26_v53, 0.0 }
   0xc   :  { %168 = vmatpush.msra.mxu2 %v76_v35  ;;  %188 = vmatpush.msra.mxu3 %v77_v36  ;;  %v22_v61 = vld [vmem:[%s383_s0 + $0x40] sm:$0xff]  ;;  %v23_v62 = vld [vmem:[%s383_s0 + $0x48] sm:$0xff]  ;;  %v67_v0 = vmax.f32 %v27_v54, 0.0  ;;  %v16_v1 = vld [vmem:[%s383_s0 + $0x10] sm:$0xff]  ;;  %v60_v3 = vmax.f32 %v20_v57, 0.0  ;;  %v61_v4 = vmax.f32 %v21_v58, 0.0 }
   0xd   :  { %147 = vmatpush.msra.mxu1 %v79_v39  ;;  %128 = vmatpush.msra.mxu0 %v74_v47  ;;  %v17_v2 = vld [vmem:[%s383_s0 + $0x18] sm:$0xff]  ;;  %v62_v5 = vmax.f32 %v22_v61, 0.0  ;;  %v63_v6 = vmax.f32 %v23_v62, 0.0  ;;  %v18_v7 = vld [vmem:[%s383_s0 + $0x20] sm:$0xff]  ;;  %v19_v8 = vld [vmem:[%s383_s0 + $0x28] sm:$0xff]  ;;  %v56_v9 = vmax.f32 %v16_v1, 0.0 }
   0xe   :  { %169 = vmatpush.msra.mxu2 %v72_v43  ;;  %189 = vmatpush.msra.mxu3 %v73_v44  ;;  %v57_v10 = vmax.f32 %v17_v2, 0.0  ;;  %v14_v11 = vld [vmem:[%s383_s0] sm:$0xff]  ;;  %v15_v12 = vld [vmem:[%s383_s0 + $0x8] sm:$0xff]  ;;  %v58_v14 = vmax.f32 %v18_v7, 0.0  ;;  %v59_v15 = vmax.f32 %v19_v8, 0.0 }
   0xf   :  { %148 = vmatpush.msra.mxu1 %v75_v48  ;;  %129 = vmatpush.msra.mxu0 %v70_v55  ;;  %v94_v13 = vld [vmem:[%s384_s1] sm:$0xff]  ;;  %v54_v16 = vmax.f32 %v14_v11, 0.0  ;;  %v55_v17 = vmax.f32 %v15_v12, 0.0 }
  0x10   :  { %170 = vmatpush.msra.mxu2 %v68_v51  ;;  %190 = vmatpush.msra.mxu3 %v69_v52  ;;  %v95_v18 = vld [vmem:[%s385_s2] sm:$0xff] }
  0x11   :  { %149 = vmatpush.msra.mxu1 %v71_v56  ;;  %130 = vmatpush.msra.mxu0 %v66_v63 }
  0x12   :  { %171 = vmatpush.msra.mxu2 %v64_v59  ;;  %191 = vmatpush.msra.mxu3 %v65_v60 }
  0x13   :  { %150 = vmatpush.msra.mxu1 %v67_v0  ;;  %131 = vmatpush.msra.mxu0 %v62_v5 }
  0x14   :  { %172 = vmatpush.msra.mxu2 %v60_v3  ;;  %192 = vmatpush.msra.mxu3 %v61_v4 }
  0x15   :  { %151 = vmatpush.msra.mxu1 %v63_v6  ;;  %132 = vmatpush.msra.mxu0 %v58_v14 }
  0x16   :  { %173 = vmatpush.msra.mxu2 %v56_v9  ;;  %193 = vmatpush.msra.mxu3 %v57_v10 }
  0x17   :  { %211 = vmatmul.msk.f32.vlgmr.msra.gmra.mxu2 %vm101_vm1, %v94_v13  ;;  %213 = vmatmul.msk.f32.vlgmr.msra.gmra.mxu3 %vm101_vm1, %v94_v13 }
  0x18   :  { %152 = vmatpush.msra.mxu1 %v59_v15  ;;  %98 = vperm.xlu0 %215, %v95_v18  }
  0x19   :  { %133 = vmatpush.msra.mxu0 %v54_v16 }
  0x1a   :  { %153 = vmatpush.msra.mxu1 %v55_v17  ;;  %207 = vmatmul.msk.f32.vlgmr.msra.gmra.mxu0 %vm101_vm1, %v94_v13 }
  0x1b   :  { %209 = vmatmul.msk.f32.vlgmr.msra.gmra.mxu1 %vm101_vm1, %v94_v13 }
  0x8a   :  { %v99_v19 = vpop.permute.xlu0 %98 }
  0x97   :  { %v135_v20 = vpop.f32.mrf.mxu0 }
  0x98   :  { %v155_v21 = vpop.f32.mrf.mxu1  ;;  %v136_v22 = vadd.f32 %v135_v20, %v99_v19 }
  0x99   :  { %v156_v23 = vadd.f32 %v155_v21, %v99_v19 }
  0x9a   :  { %v175_v24 = vpop.f32.mrf.mxu2  ;;  %v195_v25 = vpop.f32.mrf.mxu3  ;;  %198 = vst [vmem:[%s386_s3] sm:$0xff] %v136_v22 }
  0x9b   :  { %v176_v26 = vadd.f32 %v175_v24, %v99_v19  ;;  %v196_v27 = vadd.f32 %v195_v25, %v99_v19  ;;  %199 = vst [vmem:[%s386_s3 + $0x8] sm:$0xff] %v156_v23 }
  0x9d   :  { %200 = vst [vmem:[%s386_s3 + $0x10] sm:$0xff] %v176_v26 }
  0x9e   :  { %201 = vst [vmem:[%s386_s3 + $0x18] sm:$0xff] %v196_v27 }

</bundles_post_ra>
